<compile_context>
chip_gen: v5e
topology: v5e:2x2
jax: 0.10.0
libtpu: 0.0.40
codegen_flags: <defaults>
</compile_context>

<pallas_src>
import functools

import jax
import jax.numpy as jnp
import numpy as np
from jax.experimental import pallas as pl
from jax.experimental.pallas import tpu as pltpu

_SUB = 8      # sublane granularity
_LANE = 128   # lane granularity


def _round_up(x, m):
    return ((x + m - 1) // m) * m


def _cdiv(a, b):
    return -(-a // b)


def _vmem_capacity_bytes():
    """Physical VMEM per core; conservative 64 MiB (v7x-sized) fallback."""
    try:
        cap = getattr(pltpu.get_tpu_info(), "vmem_capacity_bytes", None)
        if cap:
            return int(cap)
    except Exception:
        pass
    return 64 * 1024 * 1024


def _default_num_cores():
    """2 TensorCores per chip on v7x, 1 on v5e/v6e."""
    try:
        kind = jax.devices()[0].device_kind.lower()
        if "v7" in kind:
            return 2
    except Exception:
        pass
    return 1


def _bc_ga_kernel(scores_ref, tgt_ref, acc_ref, *, n_rows):
    """One batch tile: acc[w, c] += sum_n onehot(t_n)[w] * log_softmax(scores)[n, c]."""
    @pl.when(pl.program_id(1) == 0)
    def _():
        acc_ref[...] = jnp.zeros_like(acc_ref)

    # log-softmax over the class axis (block last dim == full C, so no lane
    # padding of the array is needed; Mosaic masks partial vregs internally).
    s = scores_ref[...].astype(jnp.float32)                 # (tb, C)
    tb = s.shape[0]
    wp = acc_ref.shape[0]

    m = jnp.max(s, axis=-1, keepdims=True)                  # (tb, 1)
    z = s - m
    lse = jnp.log(jnp.sum(jnp.exp(z), axis=-1, keepdims=True))
    log_p = z - lse                                          # (tb, C)

    # Logical (unclamped) row indices of this tile -> batch-tail validity mask.
    blk = pl.program_id(0) * pl.num_programs(1) + pl.program_id(1)
    rows = blk * tb + jax.lax.broadcasted_iota(jnp.int32, (tb, 1), 0)
    valid = rows < n_rows                                    # (tb, 1) bool

    # One-hot(targets); invalid (out-of-bounds tail / phantom) rows get an
    # all-zero one-hot row AND a zeroed log_p row so garbage / NaN / Inf from
    # the ragged edge cannot leak through the MXU accumulation.
    tgt = tgt_ref[...]                                       # (tb, 1) int32
    lanes = jax.lax.broadcasted_iota(jnp.int32, (tb, wp), 1)
    onehot = ((lanes == tgt) & valid).astype(jnp.float32)    # (tb, Wp)
    log_p = jnp.where(valid, log_p, 0.0)

    # G += onehot^T @ log_p  (MXU, contract over the batch rows of this tile).
    acc_ref[...] += jax.lax.dot_general(
        onehot, log_p, (((0,), (0,)), ((), ())),
        preferred_element_type=jnp.float32)                  # (Wp, C)


def backward_correction_with_ga(scores, R, targets, *, tile_b=None, num_cores=None,
                                vmem_budget_bytes=None):
    """scores: (N, C) float, R: (C, W) float, targets: (N,) int in [0, W)."""
    N, C = scores.shape
    C2, W = R.shape
    assert C2 == C, "R must be (num_classes, num_weak_labels)"

    if num_cores is None:
        num_cores = _default_num_cores()

    vmem_cap = _vmem_capacity_bytes()
    if vmem_budget_bytes is None:
        # ~96 MiB on 128-MiB parts (v5e/v6e), ~48 MiB on v7x.
        vmem_budget_bytes = int(vmem_cap * 0.75)
    vmem_limit = int(min(vmem_cap, vmem_budget_bytes + (8 << 20)))

    itemsize = jnp.dtype(scores.dtype).itemsize
    c_vmem = _round_up(max(C, _LANE), _LANE)        # lane-padded VMEM footprint of C
    w_pad = _round_up(max(W, _SUB), _SUB)           # sublane-padded accumulator rows

    # Tile sizing: target ~2 MiB of streamed scores per block (amortizes the
    # ~0.35 us per-grid-step overhead), then clamp by the VMEM budget.
    if tile_b is None:
        tile_b = int(min(8192, max(512, (2 << 20) // max(c_vmem * itemsize, 1))))
    per_row = (2 * c_vmem * itemsize                # scores double-buffer
               + 2 * _LANE * 4                      # (tb,1) int32 targets, lane-padded, dbl-buf
               + 5 * c_vmem * 4                     # f32 temporaries (s, z, exp, log_p, masked)
               + w_pad * 4)                         # one-hot row
    fixed = 2 * w_pad * c_vmem * 4 + (2 << 20)      # resident accumulator + slack
    avail = max(vmem_budget_bytes - fixed, 1 << 20)
    max_tb = max(_SUB, (avail // per_row) // _SUB * _SUB)
    tile_b = int(min(tile_b, max_tb, _round_up(N, _SUB)))
    tile_b = max(_SUB, (tile_b // _SUB) * _SUB)

    n_blocks = _cdiv(N, tile_b)
    num_cores = max(1, min(num_cores, n_blocks))
    inner = _cdiv(n_blocks, num_cores)

    # Targets as a tiny (N, 1) int32 column; scores are streamed unpadded.
    tgt2d = targets.astype(jnp.int32).reshape(N, 1)

    def batch_map(c, i):
        # Clamp phantom trailing blocks (last core) onto the last real block;
        # the in-kernel logical-row mask (rows >= N) zeroes their contribution.
        return (jnp.minimum(c * inner + i, n_blocks - 1), 0)

    out = pl.pallas_call(
        functools.partial(_bc_ga_kernel, n_rows=N),
        out_shape=jax.ShapeDtypeStruct((num_cores * w_pad, C), jnp.float32),
        grid_spec=pltpu.PrefetchScalarGridSpec(
            num_scalar_prefetch=0,
            grid=(num_cores, inner),
            in_specs=[
                pl.BlockSpec((tile_b, C), batch_map),
                pl.BlockSpec((tile_b, 1), batch_map),
            ],
            out_specs=pl.BlockSpec((w_pad, C), lambda c, i: (c, 0)),
        ),
        compiler_params=pltpu.CompilerParams(
            # TODO(synk): verify the leading axis shards across both v7x
            # TensorCores; switch to pltpu.CORE_PARALLEL if bundle dumps show
            # the whole grid running on one core.
            dimension_semantics=("parallel", "arbitrary"),
            vmem_limit_bytes=vmem_limit,
        ),
    )(scores, tgt2d)

    # Tiny epilogue in the wrapper: combine per-core partials, contract with R,
    # mean over the real batch, abs-sum over classes.
    G = out.reshape(num_cores, w_pad, C).sum(axis=0)                     # (Wp, C)
    rlog_p = jnp.sum(R.astype(jnp.float32).T * G[:W, :], axis=0) / jnp.float32(N)
    return jnp.sum(jnp.abs(rlog_p))                                      # == (-Rlog_p).abs().sum()


def _reference(scores, R, targets):
    log_p = jax.nn.log_softmax(scores.astype(jnp.float32), axis=1)
    r_t = R[:, targets].T.astype(jnp.float32)
    rlog_p = jnp.mean(log_p * r_t, axis=0)
    return jnp.sum(jnp.abs(-rlog_p))


if __name__ == "__main__":
    key = jax.random.PRNGKey(0)
    k_scores, k_R, k_tgt = jax.random.split(key, 3)

    N = 32            # batch
    C = 16            # num_classes (rows of R)
    W = 10            # number of weak-label classes (columns of R)

    scores = jax.random.normal(k_scores, (N, C), dtype=jnp.float32)
    # Deterministic synthetic correction matrix R (column-stochastic "backward" matrix).
    R = jax.random.uniform(k_R, (C, W), dtype=jnp.float32)
    R = R / jnp.sum(R, axis=0, keepdims=True)
    targets = jax.random.randint(k_tgt, (N,), 0, W, dtype=jnp.int32)

    # TODO(synk): base_loss != 'cross_entropy' raises in the PyTorch module; only
    # the cross_entropy path is implemented here.
    loss = backward_correction_with_ga(scores, R, targets)
    loss = jax.block_until_ready(loss)

    ref = jax.block_until_ready(_reference(scores, R, targets))
    np.testing.assert_allclose(np.asarray(loss), np.asarray(ref), rtol=1e-5, atol=1e-5)

    print("KERNEL_OK")
</pallas_src>

<mosaic_0001>
module attributes {stable_mosaic.version = 11 : i64} {
  func.func @_bc_ga_kernel(%arg0: i32, %arg1: i32, %arg2: memref<32x16xf32, #tpu.memory_space<vmem>>, %arg3: memref<32x1xi32, #tpu.memory_space<vmem>>, %arg4: memref<16x16xf32, #tpu.memory_space<vmem>>) attributes {dimension_semantics = [#tpu.dimension_semantics<parallel>, #tpu.dimension_semantics<arbitrary>], iteration_bounds = array<i64: 1, 1>, scalar_prefetch = 0 : i64, scratch_operands = 0 : i64, tpu.core_type = #tpu.core_type<tc>, window_params = [{transform_indices = @transform_0, window_bounds = array<i64: 32, 16>}, {transform_indices = @transform_1, window_bounds = array<i64: 32, 1>}, {transform_indices = @transform_2, window_bounds = array<i64: 16, 16>}]} {
    %c0_i32 = arith.constant 0 : i32
    %0 = arith.cmpi eq, %arg1, %c0_i32 : i32
    %1 = arith.extui %0 : i1 to i32
    %c0_i32_0 = arith.constant 0 : i32
    %2 = arith.cmpi ne, %1, %c0_i32_0 : i32
    scf.if %2 {
      %cst_12 = arith.constant 0.000000e+00 : f32
      %38 = vector.broadcast %cst_12 : f32 to vector<16x16xf32>
      %c0_13 = arith.constant 0 : index
      %c0_14 = arith.constant 0 : index
      %39 = vector.load %arg4[%c0_13, %c0_14] : memref<16x16xf32, #tpu.memory_space<vmem>>, vector<16x16xf32>
      tpu.vector_store %arg4[%c0_13, %c0_14], %38 {strides = array<i32>} : memref<16x16xf32, #tpu.memory_space<vmem>>, vector<16x16xf32>,
    } else {
    }
    %c0 = arith.constant 0 : index
    %c0_1 = arith.constant 0 : index
    %3 = vector.load %arg2[%c0, %c0_1] : memref<32x16xf32, #tpu.memory_space<vmem>>, vector<32x16xf32>
    %cst = arith.constant dense<0xFF800000> : vector<32xf32>
    %4 = vector.multi_reduction <maximumf>, %3, %cst [1] : vector<32x16xf32> to vector<32xf32>
    %5 = vector.shape_cast %4 : vector<32xf32> to vector<32x1xf32>
    %6 = vector.broadcast %5 : vector<32x1xf32> to vector<32x16xf32>
    %7 = arith.subf %3, %6 : vector<32x16xf32>
    %8 = math.exp %7 : vector<32x16xf32>
    %cst_2 = arith.constant dense<0.000000e+00> : vector<32xf32>
    %9 = vector.multi_reduction <add>, %8, %cst_2 [1] : vector<32x16xf32> to vector<32xf32>
    %10 = vector.shape_cast %9 : vector<32xf32> to vector<32x1xf32>
    %11 = math.log %10 : vector<32x1xf32>
    %12 = vector.broadcast %11 : vector<32x1xf32> to vector<32x16xf32>
    %13 = arith.subf %7, %12 : vector<32x16xf32>
    %c1_i32 = arith.constant 1 : i32
    %14 = arith.muli %arg0, %c1_i32 : i32
    %15 = arith.addi %14, %arg1 : i32
    %c32_i32 = arith.constant 32 : i32
    %16 = arith.muli %15, %c32_i32 : i32
    %17 = tpu.iota {dimensions = array<i32: 0>} : vector<32x1xi32>
    %18 = vector.broadcast %16 : i32 to vector<32x1xi32>
    %19 = arith.addi %18, %17 : vector<32x1xi32>
    %c32_i32_3 = arith.constant 32 : i32
    %20 = vector.broadcast %c32_i32_3 : i32 to vector<32x1xi32>
    %21 = arith.cmpi slt, %19, %20 : vector<32x1xi32>
    %c0_4 = arith.constant 0 : index
    %c0_5 = arith.constant 0 : index
    %22 = vector.load %arg3[%c0_4, %c0_5] : memref<32x1xi32, #tpu.memory_space<vmem>>, vector<32x1xi32>
    %23 = tpu.iota {dimensions = array<i32: 1>} : vector<32x16xi32>
    %24 = vector.broadcast %22 : vector<32x1xi32> to vector<32x16xi32>
    %25 = arith.cmpi eq, %23, %24 : vector<32x16xi32>
    %26 = vector.broadcast %21 : vector<32x1xi1> to vector<32x16xi1>
    %27 = arith.andi %25, %26 : vector<32x16xi1>
    %28 = arith.extui %27 : vector<32x16xi1> to vector<32x16xi32>
    %29 = arith.sitofp %28 : vector<32x16xi32> to vector<32x16xf32>
    %cst_6 = arith.constant 0.000000e+00 : f32
    %30 = vector.shape_cast %21 : vector<32x1xi1> to vector<32x1xi1>
    %31 = vector.broadcast %30 : vector<32x1xi1> to vector<32x16xi1>
    %32 = vector.broadcast %cst_6 : f32 to vector<32x16xf32>
    %33 = arith.select %31, %13, %32 : vector<32x16xi1>, vector<32x16xf32>
    %c0_7 = arith.constant 0 : index
    %c0_8 = arith.constant 0 : index
    %34 = vector.load %arg4[%c0_7, %c0_8] : memref<16x16xf32, #tpu.memory_space<vmem>>, vector<16x16xf32>
    %cst_9 = arith.constant dense<0.000000e+00> : vector<16x16xf32>
    %35 = tpu.matmul %29, %33, %cst_9 {dimension_numbers = #tpu.dot_dimension_numbers<[0], [0], [1], [1], [0, 1, 1, 1], [], []>} : vector<32x16xf32>, vector<32x16xf32>, vector<16x16xf32> -> vector<16x16xf32>
    %36 = arith.addf %34, %35 : vector<16x16xf32>
    %c0_10 = arith.constant 0 : index
    %c0_11 = arith.constant 0 : index
    %37 = vector.load %arg4[%c0_10, %c0_11] : memref<16x16xf32, #tpu.memory_space<vmem>>, vector<16x16xf32>
    tpu.vector_store %arg4[%c0_10, %c0_11], %36 {strides = array<i32>} : memref<16x16xf32, #tpu.memory_space<vmem>>, vector<16x16xf32>,
    return
  }
  func.func @transform_0(%arg0: i32, %arg1: i32) -> (i32, i32) {
    %c1_i32 = arith.constant 1 : i32
    %0 = arith.muli %arg0, %c1_i32 : i32
    %1 = arith.addi %0, %arg1 : i32
    %c0_i32 = arith.constant 0 : i32
    %2 = arith.minsi %1, %c0_i32 : i32
    %c0_i32_0 = arith.constant 0 : i32
    %c0_i32_1 = arith.constant 0 : i32
    return %2, %c0_i32_0 : i32, i32
  }
  func.func @transform_1(%arg0: i32, %arg1: i32) -> (i32, i32) {
    %c1_i32 = arith.constant 1 : i32
    %0 = arith.muli %arg0, %c1_i32 : i32
    %1 = arith.addi %0, %arg1 : i32
    %c0_i32 = arith.constant 0 : i32
    %2 = arith.minsi %1, %c0_i32 : i32
    %c0_i32_0 = arith.constant 0 : i32
    %c0_i32_1 = arith.constant 0 : i32
    return %2, %c0_i32_0 : i32, i32
  }
  func.func @transform_2(%arg0: i32, %arg1: i32) -> (i32, i32) {
    %c0_i32 = arith.constant 0 : i32
    %c0_i32_0 = arith.constant 0 : i32
    return %arg0, %c0_i32 : i32, i32
  }
}

</mosaic_0001>

<bundles_post_ra>
// kernel: tpu_custom_call.1
= control target key start
LH: loop header
LB: loop body
LE: loop exit
PB: predicated region body
PF: predicated region fallthrough
CT: control target
= control target key end

     0   :  { %vm80_vm0 = vcmask 130048   ;;  %v356_v4 = vmov 0   ;;  %s419_s0 = inlined_call_operand.vmem [shape: f32[32,16], index: 0, kind: input, shape index: {}]   ;;  %s420_s1 = inlined_call_operand.vmem [shape: s32[32,1], index: 1, kind: input, shape index: {}]   ;;  %s421_s2 = inlined_call_operand.hbm [shape: f32[16,16], index: 2, kind: output, shape index: {}]  }
   0x1   :  { %v86_v0 = vld [vmem:[%s419_s0 + $0x18] sm:$0xff]  ;;  %v84_v1 = vld [vmem:[%s419_s0 + $0x8] sm:$0xff]  ;;  %311 = vset.pattern.permute.xlu2 %v356_v4  ;;  %v152_v5 = vld [vmem:[%s420_s1] sm:$0xff]  ;;  %312 = vset.pattern.permute.xlu0 %v356_v4 }
   0x2   :  { %v97_v2 = vsel %vm80_vm0, %v86_v0, -inf  ;;  %v91_v3 = vsel %vm80_vm0, %v84_v1, -inf }
   0x3   :  { %98 = vmax.xlane.f32.xlu0 %v97_v2  ;;  %92 = vmax.xlane.f32.xlu1 %v91_v3 }
   0x4   :  { %7 = vsyncpa [#allocation3], 0  ;;  %159 = vperm.xlu2 %311, %v152_v5   ;;  %313 = vset.pattern.permute.xlu1 %v356_v4  ;;  %v85_v6 = vld [vmem:[%s419_s0 + $0x10] sm:$0xff]  ;;  %v83_v7 = vld [vmem:[%s419_s0] sm:$0xff]  ;;  %v357_v13 = vmov 0.0   ;;  %v156_v34 = vlaneseq  ;;  %vm232_vm5 = vcmask 261120  }
   0x5   :  { %v94_v8 = vsel %vm80_vm0, %v85_v6, -inf  ;;  %v88_v9 = vsel %vm80_vm0, %v83_v7, -inf  ;;  %v153_v10 = vld [vmem:[%s420_s1 + $0x8] sm:$0xff]  ;;  %v154_v11 = vld [vmem:[%s420_s1 + $0x10] sm:$0xff]  ;;  %v155_v12 = vld [vmem:[%s420_s1 + $0x18] sm:$0xff]  ;;  %81 = vst.msk [vmem:[#allocation2] sm:$0xff] %vm80_vm0, %v357_v13 }
   0x6   :  { %82 = vst.msk [vmem:[#allocation2 + $0x8] sm:$0xff] %vm80_vm0, %v357_v13  ;;  %v157_v36 = vand.u32 127, %v156_v34  ;;  %s358_s0 = smov [#allocation2]   ;;  %s272_s27 = sshll.u32 %s421_s2, 4  ;;  %s273_s27 = int_to_ptr.hbm [resolvable:$true] %s272_s27 }
   0x7   :  { %s270_s1 = sshll.u32 %s358_s0, 4  ;;  %s359_s28 = smov 128   ;;  %s271_s1 = int_to_ptr.vmem [resolvable:$true] %s270_s1 }
   0x8   :  { %s360_s29 = smov 8  }
   0xb   :  { %95 = vmax.xlane.f32.xlu0 %v94_v8  ;;  %89 = vmax.xlane.f32.xlu1 %v88_v9 }
   0xc   :  { %162 = vperm.xlu2 %311, %v153_v10   ;;  %v198_v62 = vld [vmem:[#allocation2] sm:$0xff] }
  0x1f   :  { %165 = vperm.xlu0 %312, %v154_v11  }
  0x24   :  { %168 = vperm.xlu1 %313, %v155_v12  }
  0x5e   :  { %v160_v35 = vpop.permute.xlu2 %159 }
  0x5f   :  { %vm170_vm1 = vcmp.eq.s32.totalorder %v157_v36, %v160_v35 }
  0x60   :  { %v296_v37 = vsel %vm170_vm1, 1.0, %v357_v13 }
  0x66   :  { %v163_v38 = vpop.permute.xlu2 %162 }
  0x67   :  { %vm171_vm2 = vcmp.eq.s32.totalorder %v157_v36, %v163_v38 }
  0x68   :  { %v297_v39 = vsel %vm171_vm2, 1.0, %v357_v13 }
  0x76   :  { %v99_v14 = vpop.xlane.xlu0 %98  ;;  %v93_v15 = vpop.xlane.xlu1 %92 }
  0x77   :  { %v103_v16 = vsub.f32 %v86_v0, %v99_v14  ;;  %v406_v17 = vsub.f32 %v84_v1, %v93_v15  ;;  %v199_v1 = vld [vmem:[#allocation2 + $0x8] sm:$0xff] }
  0x79   :  { %v110_v18 = vmul.f32 1.442695, %v103_v16  ;;  %v106_v19 = vmul.f32 1.442695, %v406_v17 }
  0x7b   :  { %314 = vpow2.f32 %v110_v18 }
  0x7c   :  { %316 = vpow2.f32 %v106_v19 }
  0x7e   :  { %v96_v20 = vpop.xlane.xlu0 %95  ;;  %v90_v21 = vpop.xlane.xlu1 %89 }
  0x7f   :  { %v102_v22 = vsub.f32 %v85_v6, %v96_v20  ;;  %v100_v23 = vsub.f32 %v83_v7, %v90_v21 }
  0x81   :  { %v315_v24 = vpop.eup %314  ;;  %v108_v25 = vmul.f32 1.442695, %v102_v22  ;;  %v104_v26 = vmul.f32 1.442695, %v100_v23 }
  0x82   :  { %v317_v27 = vpop.eup %316  ;;  %v121_v28 = vsel %vm80_vm0, %v315_v24, 0.0 }
  0x83   :  { %318 = vpow2.f32 %v108_v25  ;;  %122 = vadd.xlane.f32.xlu2 %v121_v28  ;;  %v115_v29 = vsel %vm80_vm0, %v317_v27, 0.0 }
  0x84   :  { %320 = vpow2.f32 %v104_v26  ;;  %116 = vadd.xlane.f32.xlu0 %v115_v29 }
  0x89   :  { %v319_v30 = vpop.eup %318 }
  0x8a   :  { %v321_v31 = vpop.eup %320  ;;  %v118_v32 = vsel %vm80_vm0, %v319_v30, 0.0 }
  0x8b   :  { %119 = vadd.xlane.f32.xlu1 %v118_v32  ;;  %v112_v33 = vsel %vm80_vm0, %v321_v31, 0.0 }
  0x8c   :  { %113 = vadd.xlane.f32.xlu2 %v112_v33 }
  0x91   :  { %v166_v40 = vpop.permute.xlu0 %165 }
  0x92   :  { %vm172_vm3 = vcmp.eq.s32.totalorder %v157_v36, %v166_v40 }
  0x93   :  { %v298_v41 = vsel %vm172_vm3, 1.0, %v357_v13 }
  0x96   :  { %v169_v42 = vpop.permute.xlu1 %168 }
  0x97   :  { %vm173_vm4 = vcmp.eq.s32.totalorder %v157_v36, %v169_v42 }
  0x98   :  { %v299_v43 = vsel %vm173_vm4, 1.0, %v357_v13 }
  0xb5   :  { %200 = vxpose.xlu2.b32.start [1/4] (short) (narrow) %v296_v37, 16 }
  0xbd   :  { %201 = vxpose.xlu2.b32.cont [2/4] (short) (narrow) %v297_v39, 16 }
  0xc5   :  { %202 = vxpose.xlu2.b32.cont [3/4] (short) (narrow) %v298_v41, 16 }
  0xcd   :  { %203 = vxpose.xlu2.b32.end [4/4] (short) (narrow) %v299_v43, 16 }
  0xf6   :  { %v123_v44 = vpop.xlane.xlu2 %122 }
  0xf7   :  { %322 = vlog2.f32 %v123_v44  ;;  %v117_v45 = vpop.xlane.xlu0 %116 }
  0xf8   :  { %324 = vlog2.f32 %v117_v45 }
  0xfd   :  { %v323_v46 = vpop.eup %322 }
  0xfe   :  { %v131_v47 = vmul.f32 0.6931472, %v323_v46  ;;  %v120_v48 = vpop.xlane.xlu1 %119  ;;  %v325_v51 = vpop.eup %324 }
  0xff   :  { %v114_v49 = vpop.xlane.xlu2 %113  ;;  %326 = vlog2.f32 %v120_v48  ;;  %v127_v54 = vmul.f32 0.6931472, %v325_v51 }
 0x100   :  { %328 = vlog2.f32 %v114_v49  ;;  %v135_v50 = vsub.f32 %v103_v16, %v131_v47 }
 0x101   :  { %v133_v58 = vsub.f32 %v406_v17, %v127_v54 }
 0x102   :  { %251 = vmatpush.msra.mxu0 %v135_v50  ;;  %302 = vmatpush.msra.mxu1 %v135_v50 }
 0x105   :  { %v327_v52 = vpop.eup %326 }
 0x106   :  { %v329_v53 = vpop.eup %328  ;;  %v129_v55 = vmul.f32 0.6931472, %v327_v52 }
 0x107   :  { %v125_v56 = vmul.f32 0.6931472, %v329_v53 }
 0x108   :  { %v134_v57 = vsub.f32 %v102_v22, %v129_v55 }
 0x109   :  { %v132_v59 = vsub.f32 %v100_v23, %v125_v56 }
 0x10a   :  { %252 = vmatpush.msra.mxu0 %v134_v57  ;;  %303 = vmatpush.msra.mxu1 %v134_v57 }
 0x10c   :  { %253 = vmatpush.msra.mxu0 %v133_v58  ;;  %304 = vmatpush.msra.mxu1 %v133_v58 }
 0x10e   :  { %254 = vmatpush.msra.mxu0 %v132_v59  ;;  %305 = vmatpush.msra.mxu1 %v132_v59 }
 0x14e   :  { %v216_v60 = vpop.trf.xlu2 }
 0x14f   :  { %300 = vmatmul.msk.f32.vlgmr.msra.gmra.mxu0 %vm232_vm5, %v216_v60 }
 0x156   :  { %v217_v61 = vpop.trf.xlu2 }
 0x157   :  { %301 = vmatmul.msk.f32.vlgmr.msra.gmra.mxu1 %vm232_vm5, %v217_v61 }
 0x1cc   :  { %v256_v63 = vpop.f32.mrf.mxu0 }
 0x1cd   :  { %v262_v0 = vadd.f32 %v256_v63, %v198_v62 }
 0x1cf   :  { %264 = vst.msk [vmem:[#allocation2] sm:$0xff] %vm80_vm0, %v262_v0 }
 0x1d4   :  { %v259_v2 = vpop.f32.mrf.mxu1 }
 0x1d5   :  { %v263_v3 = vadd.f32 %v259_v2, %v199_v1 }
 0x1d7   :  { %265 = vst.msk [vmem:[#allocation2 + $0x8] sm:$0xff] %vm80_vm0, %v263_v3 }
 0x1d8   :  { %278 = dma.vmem_to_hbm [thread:$0]  %s271_s1, 256, %s273_s27, [#allocation3], %s359_s28, %s359_s28, %s360_s29  }
 0x1d9   :  { %354 = dma.done.wait [#allocation3], 256  }
 0x1da   :  { %355 = vsyncadd [#allocation3], 4294967040 }
 0x1db   :  { %283 = vsyncpa [#allocation3], 1 }

</bundles_post_ra>
